<compile_context>
chip_gen: v6e
topology: v6e:2x2x1
jax: 0.10.0
libtpu: 0.0.40
codegen_flags: <defaults>
</compile_context>

<pallas_src>
import functools

import jax
import jax.numpy as jnp
from jax import lax
from jax.experimental import pallas as pl
from jax.experimental.pallas import tpu as pltpu

BOARD = 9 * 9            # 81 real features
D_PAD = 128              # lane-padded feature width
N_BLOCKS = 8             # resnet18 -> 8 basic (2-layer) residual blocks
N_LAYERS = 2 * N_BLOCKS  # 16 stacked linear layers
N_POLICY = 4             # policy head outputs (lanes 0..3)
N_VALUE = 1              # value head output  (lane 4)
TB = 128                 # batch tile (rows per grid step)

# Largest float32 strictly below 1.0 — plain Python float so it is baked into
# the jaxpr as a literal, NOT captured as a constant array.
_ONE_MINUS_ULP = 1.0 - 2.0 ** -24


def _net_kernel(x_ref, wb_ref, bb_ref, wh_ref, bh_ref, out_ref):
    """Fused residual-MLP backbone + fused policy/value head (one batch tile).

    x_ref  : (TB, D_PAD)               f32   board features (zero-padded)
    wb_ref : (N_LAYERS, D_PAD, D_PAD)  bf16  stacked backbone weights
                                             (layer 2i / 2i+1 = block i)
    bb_ref : (N_LAYERS, 1, D_PAD)      f32   stacked backbone biases
    wh_ref : (D_PAD, D_PAD)            bf16  fused head weight
                                             (cols 0..3 policy, col 4 value)
    bh_ref : (1, D_PAD)                f32   fused head bias
    out_ref: (TB, D_PAD)               f32   lanes 0..3 sigmoid(policy),
                                             lane 4 tanh(value)
    """
    h0 = x_ref[...]

    # Residual MLP backbone: 8 basic blocks of 2 linear layers.
    # fori_loop (not a static unroll) bounds each 8-vreg weight tile's live
    # range so the 16 weight tiles never pressure the 64-vreg file.
    def block(i, h):
        y = jnp.dot(h.astype(jnp.bfloat16), wb_ref[2 * i],
                    preferred_element_type=jnp.float32) + bb_ref[2 * i]
        y = jnp.maximum(y, 0.0)
        z = jnp.dot(y.astype(jnp.bfloat16), wb_ref[2 * i + 1],
                    preferred_element_type=jnp.float32) + bb_ref[2 * i + 1]
        return jnp.maximum(z + h, 0.0)

    h = lax.fori_loop(0, N_BLOCKS, block, h0)

    # Fused policy + value head: one matmul, one tanh pass on the EUP.
    head = jnp.dot(h.astype(jnp.bfloat16), wh_ref[...],
                   preferred_element_type=jnp.float32) + bh_ref[...]

    lane = lax.broadcasted_iota(jnp.int32, head.shape, dimension=1)
    is_pol = lane < N_POLICY
    # sigmoid(x) = 0.5 * (1 + tanh(x / 2)) -> single transcendental pass.
    t = jnp.tanh(jnp.where(is_pol, 0.5 * head, head))
    # Policy lanes clamped strictly below 1.0 (forward assumes y_pred[k] in
    # [0, 1) for int(y * N) indexing).  Value lane(s): plain tanh.
    pol = jnp.minimum(0.5 * (t + 1.0), _ONE_MINUS_ULP)
    out_ref[...] = jnp.where(is_pol, pol, t)


@jax.jit
def net_forward(x, params):
    """x: (B, 81) f32 board features -> (policy (B, 4), value (B, 1)).

    Batch many positions / augmentations per call (B >= 128 recommended);
    B_pad is derived from the static shape, so no per-call recompiles.
    """
    B = x.shape[0]
    B_pad = max(TB, ((B + TB - 1) // TB) * TB)
    x_pad = jnp.zeros((B_pad, D_PAD), jnp.float32).at[:B, :BOARD].set(x)

    out = pl.pallas_call(
        _net_kernel,
        out_shape=jax.ShapeDtypeStruct((B_pad, D_PAD), jnp.float32),
        grid=(B_pad // TB,),
        in_specs=[
            # Activations: tiled along batch, double-buffered by the pipeline.
            pl.BlockSpec((TB, D_PAD), lambda i: (i, 0)),
            # Weights / biases: constant block index -> DMA'd once, resident.
            pl.BlockSpec((N_LAYERS, D_PAD, D_PAD), lambda i: (0, 0, 0)),
            pl.BlockSpec((N_LAYERS, 1, D_PAD), lambda i: (0, 0, 0)),
            pl.BlockSpec((D_PAD, D_PAD), lambda i: (0, 0)),
            pl.BlockSpec((1, D_PAD), lambda i: (0, 0)),
        ],
        out_specs=pl.BlockSpec((TB, D_PAD), lambda i: (i, 0)),
        compiler_params=pltpu.CompilerParams(
            dimension_semantics=("parallel",)),   # shards batch over v7x TCs
    )(x_pad, params["wb"], params["bb"], params["wh"], params["bh"])

    policy = out[:B, :N_POLICY]
    value = out[:B, N_POLICY:N_POLICY + N_VALUE]
    return policy, value


def init_params(key):
    """Deterministic synthetic weights; real 81-dim net zero-padded to 128.

    Backbone / head matmul weights in bfloat16 (MXU-native), stacked into one
    array each; biases stay float32.  Padding rows/cols are zero so padded
    lanes of h remain exactly zero through every residual block.
    """
    ks = jax.random.split(key, 4 * N_BLOCKS + 4)
    scale = 1.0 / jnp.sqrt(jnp.float32(BOARD))

    def pad_mat(w):                      # (81, n) -> (128, 128) f32
        out = jnp.zeros((D_PAD, D_PAD), jnp.float32)
        return out.at[:w.shape[0], :w.shape[1]].set(w)

    def pad_vec(b, col_off=0):           # (n,) -> (1, 128) f32
        out = jnp.zeros((1, D_PAD), jnp.float32)
        return out.at[0, col_off:col_off + b.shape[0]].set(b)

    w_layers, b_layers = [], []
    for i in range(N_BLOCKS):
        w_layers.append(pad_mat(jax.random.normal(ks[4 * i + 0], (BOARD, BOARD)) * scale))
        b_layers.append(pad_vec(jax.random.normal(ks[4 * i + 1], (BOARD,)) * 0.01))
        w_layers.append(pad_mat(jax.random.normal(ks[4 * i + 2], (BOARD, BOARD)) * scale))
        b_layers.append(pad_vec(jax.random.normal(ks[4 * i + 3], (BOARD,)) * 0.01))

    k = 4 * N_BLOCKS
    wp = jax.random.normal(ks[k + 0], (BOARD, N_POLICY)) * scale   # policy 81->4
    bp = jax.random.normal(ks[k + 1], (N_POLICY,)) * 0.01
    wv = jax.random.normal(ks[k + 2], (BOARD, N_VALUE)) * scale    # value  81->1
    bv = jax.random.normal(ks[k + 3], (N_VALUE,)) * 0.01

    # Fused head: policy weights in output cols 0..3, value weight in col 4.
    wh = jnp.zeros((D_PAD, D_PAD), jnp.float32)
    wh = wh.at[:BOARD, :N_POLICY].set(wp)
    wh = wh.at[:BOARD, N_POLICY:N_POLICY + N_VALUE].set(wv)
    bh = pad_vec(bp, col_off=0) + pad_vec(bv, col_off=N_POLICY)

    return {
        "wb": jnp.stack(w_layers).astype(jnp.bfloat16),  # (16, 128, 128) bf16
        "bb": jnp.stack(b_layers),                       # (16, 1, 128)   f32
        "wh": wh.astype(jnp.bfloat16),                   # (128, 128)     bf16
        "bh": bh,                                        # (1, 128)       f32
    }


if __name__ == "__main__":
    key = jax.random.PRNGKey(0)
    k_x, k_p = jax.random.split(key)

    # The forward builds 8 augmented copies of (board + 3 shape planes) per
    # game state before querying the net; batch 32 states x 8 augmentations
    # so each kernel call sees full 128-row MXU tiles and the grid has >1
    # batch tile (2 parallel steps -> both TensorCores on v7x).
    N_POSITIONS = 32
    N_AUG = 8
    B = N_POSITIONS * N_AUG            # 256 rows
    x = jax.random.uniform(k_x, (B, BOARD), jnp.float32)

    params = init_params(k_p)
    policy, value = net_forward(x, params)
    jax.block_until_ready((policy, value))

    assert policy.shape == (B, N_POLICY) and value.shape == (B, N_VALUE)
    assert bool(jnp.all(jnp.isfinite(policy))) and bool(jnp.all(jnp.isfinite(value)))
    assert bool(jnp.all(policy >= 0.0)) and bool(jnp.all(policy < 1.0))
    assert bool(jnp.all(jnp.abs(value) <= 1.0))
    print("KERNEL_OK")
</pallas_src>

<mosaic_0001>
module attributes {stable_mosaic.version = 11 : i64} {
  func.func @_net_kernel(%arg0: i32, %arg1: memref<128x128xf32, #tpu.memory_space<vmem>>, %arg2: memref<16x128x128xbf16, #tpu.memory_space<vmem>>, %arg3: memref<16x1x128xf32, #tpu.memory_space<vmem>>, %arg4: memref<128x128xbf16, #tpu.memory_space<vmem>>, %arg5: memref<1x128xf32, #tpu.memory_space<vmem>>, %arg6: memref<128x128xf32, #tpu.memory_space<vmem>>) attributes {dimension_semantics = [#tpu.dimension_semantics<parallel>], iteration_bounds = array<i64: 2>, scalar_prefetch = 0 : i64, scratch_operands = 0 : i64, tpu.core_type = #tpu.core_type<tc>, window_params = [{transform_indices = @transform_0, window_bounds = array<i64: 128, 128>}, {pipeline_mode = #tpu.pipeline_mode<synchronous>, transform_indices = @transform_1, window_bounds = array<i64: 16, 128, 128>}, {pipeline_mode = #tpu.pipeline_mode<synchronous>, transform_indices = @transform_2, window_bounds = array<i64: 16, 1, 128>}, {pipeline_mode = #tpu.pipeline_mode<synchronous>, transform_indices = @transform_3, window_bounds = array<i64: 128, 128>}, {pipeline_mode = #tpu.pipeline_mode<synchronous>, transform_indices = @transform_4, window_bounds = array<i64: 1, 128>}, {transform_indices = @transform_5, window_bounds = array<i64: 128, 128>}]} {
    %c0 = arith.constant 0 : index
    %c0_0 = arith.constant 0 : index
    %0 = vector.load %arg1[%c0, %c0_0] : memref<128x128xf32, #tpu.memory_space<vmem>>, vector<128x128xf32>
    %c0_i32 = arith.constant 0 : i32
    %c8_i32 = arith.constant 8 : i32
    %1 = arith.addi %c0_i32, %c8_i32 : i32
    %c1_i32 = arith.constant 1 : i32
    %2 = scf.for %arg7 = %c0_i32 to %1 step %c1_i32 iter_args(%arg8 = %0) -> (vector<128x128xf32>)  : i32 {
      %24 = arith.truncf %arg8 : vector<128x128xf32> to vector<128x128xbf16>
      %c2_i32 = arith.constant 2 : i32
      %25 = arith.muli %c2_i32, %arg7 : i32
      %26 = arith.index_cast %25 : i32 to index
      %c0_12 = arith.constant 0 : index
      %c0_13 = arith.constant 0 : index
      %27 = vector.load %arg2[%26, %c0_12, %c0_13] : memref<16x128x128xbf16, #tpu.memory_space<vmem>>, vector<1x128x128xbf16>
      %28 = vector.shape_cast %27 : vector<1x128x128xbf16> to vector<128x128xbf16>
      %cst_14 = arith.constant dense<0.000000e+00> : vector<128x128xf32>
      %29 = tpu.matmul %24, %28, %cst_14 {dimension_numbers = #tpu.dot_dimension_numbers<[1], [0], [0], [1], [0, 0, 1, 1], [], []>} : vector<128x128xbf16>, vector<128x128xbf16>, vector<128x128xf32> -> vector<128x128xf32>
      %c2_i32_15 = arith.constant 2 : i32
      %30 = arith.muli %c2_i32_15, %arg7 : i32
      %31 = arith.index_cast %30 : i32 to index
      %c0_16 = arith.constant 0 : index
      %c0_17 = arith.constant 0 : index
      %32 = vector.load %arg3[%31, %c0_16, %c0_17] : memref<16x1x128xf32, #tpu.memory_space<vmem>>, vector<1x1x128xf32>
      %33 = vector.shape_cast %32 : vector<1x1x128xf32> to vector<1x128xf32>
      %34 = vector.broadcast %33 : vector<1x128xf32> to vector<128x128xf32>
      %35 = arith.addf %29, %34 : vector<128x128xf32>
      %cst_18 = arith.constant 0.000000e+00 : f32
      %36 = vector.broadcast %cst_18 : f32 to vector<128x128xf32>
      %37 = arith.maximumf %35, %36 : vector<128x128xf32>
      %38 = arith.truncf %37 : vector<128x128xf32> to vector<128x128xbf16>
      %c2_i32_19 = arith.constant 2 : i32
      %39 = arith.muli %c2_i32_19, %arg7 : i32
      %c1_i32_20 = arith.constant 1 : i32
      %40 = arith.addi %39, %c1_i32_20 : i32
      %41 = arith.index_cast %40 : i32 to index
      %c0_21 = arith.constant 0 : index
      %c0_22 = arith.constant 0 : index
      %42 = vector.load %arg2[%41, %c0_21, %c0_22] : memref<16x128x128xbf16, #tpu.memory_space<vmem>>, vector<1x128x128xbf16>
      %43 = vector.shape_cast %42 : vector<1x128x128xbf16> to vector<128x128xbf16>
      %cst_23 = arith.constant dense<0.000000e+00> : vector<128x128xf32>
      %44 = tpu.matmul %38, %43, %cst_23 {dimension_numbers = #tpu.dot_dimension_numbers<[1], [0], [0], [1], [0, 0, 1, 1], [], []>} : vector<128x128xbf16>, vector<128x128xbf16>, vector<128x128xf32> -> vector<128x128xf32>
      %c2_i32_24 = arith.constant 2 : i32
      %45 = arith.muli %c2_i32_24, %arg7 : i32
      %c1_i32_25 = arith.constant 1 : i32
      %46 = arith.addi %45, %c1_i32_25 : i32
      %47 = arith.index_cast %46 : i32 to index
      %c0_26 = arith.constant 0 : index
      %c0_27 = arith.constant 0 : index
      %48 = vector.load %arg3[%47, %c0_26, %c0_27] : memref<16x1x128xf32, #tpu.memory_space<vmem>>, vector<1x1x128xf32>
      %49 = vector.shape_cast %48 : vector<1x1x128xf32> to vector<1x128xf32>
      %50 = vector.broadcast %49 : vector<1x128xf32> to vector<128x128xf32>
      %51 = arith.addf %44, %50 : vector<128x128xf32>
      %52 = arith.addf %51, %arg8 : vector<128x128xf32>
      %cst_28 = arith.constant 0.000000e+00 : f32
      %53 = vector.broadcast %cst_28 : f32 to vector<128x128xf32>
      %54 = arith.maximumf %52, %53 : vector<128x128xf32>
      scf.yield %54 : vector<128x128xf32>
    }
    %c8_i32_1 = arith.constant 8 : i32
    %3 = arith.truncf %2 : vector<128x128xf32> to vector<128x128xbf16>
    %c0_2 = arith.constant 0 : index
    %c0_3 = arith.constant 0 : index
    %4 = vector.load %arg4[%c0_2, %c0_3] : memref<128x128xbf16, #tpu.memory_space<vmem>>, vector<128x128xbf16>
    %cst = arith.constant dense<0.000000e+00> : vector<128x128xf32>
    %5 = tpu.matmul %3, %4, %cst {dimension_numbers = #tpu.dot_dimension_numbers<[1], [0], [0], [1], [0, 0, 1, 1], [], []>} : vector<128x128xbf16>, vector<128x128xbf16>, vector<128x128xf32> -> vector<128x128xf32>
    %c0_4 = arith.constant 0 : index
    %c0_5 = arith.constant 0 : index
    %6 = vector.load %arg5[%c0_4, %c0_5] : memref<1x128xf32, #tpu.memory_space<vmem>>, vector<1x128xf32>
    %7 = vector.broadcast %6 : vector<1x128xf32> to vector<128x128xf32>
    %8 = arith.addf %5, %7 : vector<128x128xf32>
    %9 = tpu.iota {dimensions = array<i32: 1>} : vector<128x128xi32>
    %c4_i32 = arith.constant 4 : i32
    %10 = vector.broadcast %c4_i32 : i32 to vector<128x128xi32>
    %11 = arith.cmpi slt, %9, %10 : vector<128x128xi32>
    %cst_6 = arith.constant 5.000000e-01 : f32
    %12 = vector.broadcast %cst_6 : f32 to vector<128x128xf32>
    %13 = arith.mulf %12, %8 : vector<128x128xf32>
    %14 = arith.select %11, %13, %8 : vector<128x128xi1>, vector<128x128xf32>
    %15 = math.tanh %14 : vector<128x128xf32>
    %cst_7 = arith.constant 1.000000e+00 : f32
    %16 = vector.broadcast %cst_7 : f32 to vector<128x128xf32>
    %17 = arith.addf %15, %16 : vector<128x128xf32>
    %cst_8 = arith.constant 5.000000e-01 : f32
    %18 = vector.broadcast %cst_8 : f32 to vector<128x128xf32>
    %19 = arith.mulf %18, %17 : vector<128x128xf32>
    %cst_9 = arith.constant 0.99999994 : f32
    %20 = vector.broadcast %cst_9 : f32 to vector<128x128xf32>
    %21 = arith.minimumf %19, %20 : vector<128x128xf32>
    %22 = arith.select %11, %21, %15 : vector<128x128xi1>, vector<128x128xf32>
    %c0_10 = arith.constant 0 : index
    %c0_11 = arith.constant 0 : index
    %23 = vector.load %arg6[%c0_10, %c0_11] : memref<128x128xf32, #tpu.memory_space<vmem>>, vector<128x128xf32>
    tpu.vector_store %arg6[%c0_10, %c0_11], %22 {strides = array<i32>} : memref<128x128xf32, #tpu.memory_space<vmem>>, vector<128x128xf32>,
    return
  }
  func.func @transform_0(%arg0: i32) -> (i32, i32) {
    %c0_i32 = arith.constant 0 : i32
    %c0_i32_0 = arith.constant 0 : i32
    return %arg0, %c0_i32 : i32, i32
  }
  func.func @transform_1(%arg0: i32) -> (i32, i32, i32) {
    %c0_i32 = arith.constant 0 : i32
    %c0_i32_0 = arith.constant 0 : i32
    %c0_i32_1 = arith.constant 0 : i32
    %c0_i32_2 = arith.constant 0 : i32
    return %c0_i32, %c0_i32_0, %c0_i32_1 : i32, i32, i32
  }
  func.func @transform_2(%arg0: i32) -> (i32, i32, i32) {
    %c0_i32 = arith.constant 0 : i32
    %c0_i32_0 = arith.constant 0 : i32
    %c0_i32_1 = arith.constant 0 : i32
    %c0_i32_2 = arith.constant 0 : i32
    return %c0_i32, %c0_i32_0, %c0_i32_1 : i32, i32, i32
  }
  func.func @transform_3(%arg0: i32) -> (i32, i32) {
    %c0_i32 = arith.constant 0 : i32
    %c0_i32_0 = arith.constant 0 : i32
    %c0_i32_1 = arith.constant 0 : i32
    return %c0_i32, %c0_i32_0 : i32, i32
  }
  func.func @transform_4(%arg0: i32) -> (i32, i32) {
    %c0_i32 = arith.constant 0 : i32
    %c0_i32_0 = arith.constant 0 : i32
    %c0_i32_1 = arith.constant 0 : i32
    return %c0_i32, %c0_i32_0 : i32, i32
  }
  func.func @transform_5(%arg0: i32) -> (i32, i32) {
    %c0_i32 = arith.constant 0 : i32
    %c0_i32_0 = arith.constant 0 : i32
    return %arg0, %c0_i32 : i32, i32
  }
}

</mosaic_0001>

<bundles_post_ra>
// kernel: net_forward.1
= control target key start
LH: loop header
LB: loop body
LE: loop exit
PB: predicated region body
PF: predicated region fallthrough
CT: control target
= control target key end

     0   :  { %s1702_s18 = smov 0   ;;  %s2135_s0 = inlined_call_operand.vmem [shape: f32[256,128], index: 0, kind: input, shape index: {}]   ;;  %s2136_s1 = inlined_call_operand.vmem [shape: bf16[16,128,128], index: 1, kind: input, shape index: {}]   ;;  %s2137_s2 = inlined_call_operand.vmem [shape: f32[16,1,128], index: 2, kind: input, shape index: {}]   ;;  %s2138_s3 = inlined_call_operand.vmem [shape: bf16[128,128], index: 3, kind: input, shape index: {}]   ;;  %s2139_s4 = inlined_call_operand.vmem [shape: f32[1,128], index: 4, kind: input, shape index: {}]   ;;  %s2140_s5 = inlined_call_operand.vmem [shape: f32[256,128], index: 5, kind: output, shape index: {}]  }
   0x1 LB: > { %s1104_s19 = sadd.s32 4294967295, %s1602_s18   ;;  %p1108_p0 = scmp.ge.s32.totalorder %s1602_s18, 1  ;;  %s1602_s18 = sphi %s1702_s18, %s15_s18  }
   0x2   : > { %p188_p1 = scmp.lt.s32.totalorder %s1602_s18, 3 }
   0x4   : > { %p189_p2 = pnand %p1108_p0, %p188_p1 }
   0x5   : > { %s1109_s20 = sshll.u32 (!%p189_p2), %s1104_s19, 4  ;;  %s1750_s28 = smov (!%p189_p2), 0  }
   0x6   : > { %192 = sbr.rel (%p189_p2) target bundleno = 753 (0x2f1), region = 40  ;;  %p217_p3 = scmp.lt.s32.totalorder (!%p189_p2), %s1109_s20, 31 }
   0xb   : > { %s2173_s20 = smov (!%p217_p3, %s1109_s20), 31 }
   0xc   : > { %s1110_s21 = sshll.u32 %s2173_s20, 3 }
   0xd   : > { %s220_s24 = scalar_lea.vmem %s2135_s0, %s1110_s21  ;;  %s1716_s27 = scalar_lea.vmem %s2140_s5, %s1110_s21 }
   0xe   : > { %v229_v0 = vld [vmem:[%s220_s24] sm:$0xff]   ;;  %v230_v1 = vld [vmem:[%s220_s24 + $0x8] sm:$0xff]   ;;  %v231_v2 = vld [vmem:[%s220_s24 + $0x10] sm:$0xff]  }
   0xf   : > { %v232_v3 = vld [vmem:[%s220_s24 + $0x18] sm:$0xff]   ;;  %v233_v4 = vld [vmem:[%s220_s24 + $0x20] sm:$0xff]   ;;  %v234_v5 = vld [vmem:[%s220_s24 + $0x28] sm:$0xff]  }
  0x10   : > { %v235_v6 = vld [vmem:[%s220_s24 + $0x30] sm:$0xff]   ;;  %v236_v7 = vld [vmem:[%s220_s24 + $0x38] sm:$0xff]   ;;  %v237_v8 = vld [vmem:[%s220_s24 + $0x40] sm:$0xff]  }
  0x11   : > { %v238_v9 = vld [vmem:[%s220_s24 + $0x48] sm:$0xff]   ;;  %v239_v10 = vld [vmem:[%s220_s24 + $0x50] sm:$0xff]   ;;  %v240_v11 = vld [vmem:[%s220_s24 + $0x58] sm:$0xff]  }
  0x12   : > { %v241_v12 = vld [vmem:[%s220_s24 + $0x60] sm:$0xff]   ;;  %v242_v13 = vld [vmem:[%s220_s24 + $0x68] sm:$0xff]   ;;  %v243_v14 = vld [vmem:[%s220_s24 + $0x70] sm:$0xff]  }
  0x13   : > { %v244_v15 = vld [vmem:[%s220_s24 + $0x78] sm:$0xff]  }
  0x14 LB: >> { %s1166_s29 = sshll.u32 %s1670_s28, 7  ;;  %v267_v16 = vpack.c.bf16 %v1662_v1, %v1666_v0  ;;  %v268_v30 = vpack.c.bf16 %v1654_v3, %v1658_v2  ;;  %v269_v31 = vpack.c.bf16 %v1646_v5, %v1650_v4  ;;  %v270_v32 = vpack.c.bf16 %v1638_v7, %v1642_v6  ;;  %s1113_s8 = sshll.u32 %s1670_s28, 1  ;;  %s1670_s28 = sphi %s1750_s28, %s250_s28   ;;  %v1666_v0 = vphi %v229_v0, %v2171_v0   ;;  %v1662_v1 = vphi %v230_v1, %v2170_v1   ;;  %v1658_v2 = vphi %v231_v2, %v2169_v2   ;;  %v1654_v3 = vphi %v232_v3, %v2168_v3   ;;  %v1650_v4 = vphi %v233_v4, %v2167_v4   ;;  %v1646_v5 = vphi %v234_v5, %v2166_v5   ;;  %v1642_v6 = vphi %v235_v6, %v2165_v6   ;;  %v1638_v7 = vphi %v236_v7, %v2164_v7   ;;  %v1634_v8 = vphi %v237_v8, %v2163_v8   ;;  %v1630_v9 = vphi %v238_v9, %v2162_v9   ;;  %v1626_v10 = vphi %v239_v10, %v2161_v10   ;;  %v1622_v11 = vphi %v240_v11, %v2160_v11   ;;  %v1618_v12 = vphi %v241_v12, %v2159_v12   ;;  %v1614_v13 = vphi %v242_v13, %v2158_v13   ;;  %v1610_v14 = vphi %v243_v14, %v2157_v14   ;;  %v1606_v15 = vphi %v244_v15, %v2156_v15  }
  0x15   : >> { %s1809_s7 = scalar_lea.vmem %s2136_s1, %s1166_s29  ;;  %v271_v33 = vpack.c.bf16 %v1630_v9, %v1634_v8  ;;  %v272_v34 = vpack.c.bf16 %v1622_v11, %v1626_v10  ;;  %v273_v35 = vpack.c.bf16 %v1614_v13, %v1618_v12  ;;  %v274_v36 = vpack.c.bf16 %v1606_v15, %v1610_v14  ;;  %s1845_s11 = scalar_lea.vmem %s2137_s2, %s1113_s8 }
  0x16   : >> { %v1472_v17 = vld [vmem:[%s1809_s7 + $0x38] sm:$0xff]   ;;  %1232 = vmatprep.mubr.bf16.mxu0 %v267_v16  ;;  %v1473_v18 = vld [vmem:[%s1809_s7 + $0x30] sm:$0xff]   ;;  %v1474_v19 = vld [vmem:[%s1809_s7 + $0x28] sm:$0xff]   ;;  %s250_s28 = sadd.s32 1, %s1670_s28  }
  0x17   : >> { %1216 = vmatprep.subr.bf16.mxu0 %v1472_v17  ;;  %v1475_v20 = vld [vmem:[%s1809_s7 + $0x20] sm:$0xff]   ;;  %v1480_v21 = vld [vmem:[%s1809_s7 + $0x78] sm:$0xff]   ;;  %v1481_v22 = vld [vmem:[%s1809_s7 + $0x70] sm:$0xff]   ;;  %p1908_p4 = scmp.ge.s32.totalorder %s250_s28, 8  }
  0x18   : >> { %1217 = vmatpush3.bf16.msra.mxu0 %v1472_v17  ;;  %1248 = vmatprep.subr.bf16.mxu1 %v1480_v21  ;;  %v1476_v23 = vld [vmem:[%s1809_s7 + $0x18] sm:$0xff]   ;;  %v1482_v24 = vld [vmem:[%s1809_s7 + $0x68] sm:$0xff]   ;;  %v1477_v25 = vld [vmem:[%s1809_s7 + $0x10] sm:$0xff]  }
  0x19   : >> { %1218 = vmatprep.subr.bf16.mxu0 %v1473_v18  ;;  %1249 = vmatpush3.bf16.msra.mxu1 %v1480_v21  ;;  %v1483_v26 = vld [vmem:[%s1809_s7 + $0x60] sm:$0xff]   ;;  %v1478_v27 = vld [vmem:[%s1809_s7 + $0x8] sm:$0xff]   ;;  %v1484_v28 = vld [vmem:[%s1809_s7 + $0x58] sm:$0xff]  }
  0x1a   : >> { %1250 = vmatprep.subr.bf16.mxu1 %v1481_v22  ;;  %v1479_v29 = vld [vmem:[%s1809_s7] sm:$0xff]   ;;  %v1485_v37 = vld [vmem:[%s1809_s7 + $0x50] sm:$0xff]   ;;  %v1486_v38 = vld [vmem:[%s1809_s7 + $0x48] sm:$0xff]  }
  0x1b   : >> { %v1487_v39 = vld [vmem:[%s1809_s7 + $0x40] sm:$0xff]  }
  0x1c   : >> { %1219 = vmatpush3.bf16.msra.mxu0 %v1473_v18  ;;  %v1116_v42 = vld [vmem:[%s1845_s11] ss:$0 sm:$0xff] }
  0x1d   : >> { %1220 = vmatprep.subr.bf16.mxu0 %v1474_v19  ;;  %1251 = vmatpush3.bf16.msra.mxu1 %v1481_v22 }
  0x1e   : >> { %1252 = vmatprep.subr.bf16.mxu1 %v1482_v24 }
  0x20   : >> { %1221 = vmatpush3.bf16.msra.mxu0 %v1474_v19 }
  0x21   : >> { %1222 = vmatprep.subr.bf16.mxu0 %v1475_v20  ;;  %1253 = vmatpush3.bf16.msra.mxu1 %v1482_v24 }
  0x22   : >> { %1254 = vmatprep.subr.bf16.mxu1 %v1483_v26 }
  0x24   : >> { %1223 = vmatpush3.bf16.msra.mxu0 %v1475_v20 }
  0x25   : >> { %1224 = vmatprep.subr.bf16.mxu0 %v1476_v23  ;;  %1255 = vmatpush3.bf16.msra.mxu1 %v1483_v26 }
  0x26   : >> { %1256 = vmatprep.subr.bf16.mxu1 %v1484_v28 }
  0x28   : >> { %1225 = vmatpush3.bf16.msra.mxu0 %v1476_v23 }
  0x29   : >> { %1226 = vmatprep.subr.bf16.mxu0 %v1477_v25  ;;  %1257 = vmatpush3.bf16.msra.mxu1 %v1484_v28 }
  0x2a   : >> { %1258 = vmatprep.subr.bf16.mxu1 %v1485_v37 }
  0x2c   : >> { %1227 = vmatpush3.bf16.msra.mxu0 %v1477_v25 }
  0x2d   : >> { %1228 = vmatprep.subr.bf16.mxu0 %v1478_v27  ;;  %1259 = vmatpush3.bf16.msra.mxu1 %v1485_v37 }
  0x2e   : >> { %1260 = vmatprep.subr.bf16.mxu1 %v1486_v38 }
  0x30   : >> { %1229 = vmatpush3.bf16.msra.mxu0 %v1478_v27 }
  0x31   : >> { %1230 = vmatprep.subr.bf16.mxu0 %v1479_v29  ;;  %1261 = vmatpush3.bf16.msra.mxu1 %v1486_v38 }
  0x32   : >> { %1262 = vmatprep.subr.bf16.mxu1 %v1487_v39 }
  0x34   : >> { %1231 = vmatpush3.bf16.msra.mxu0 %v1479_v29 }
  0x35   : >> { %1263 = vmatpush3.bf16.msra.mxu1 %v1487_v39 }
  0x37   : >> { %1233 = vmatmul.mubr.bf16.vlgmr.msra.gmra.mxu0 %v268_v30 }
  0x38   : >> { %1236 = vmatprep.mubr.bf16.mxu0 %v269_v31 }
  0x3f   : >> { %1237 = vmatmul.mubr.bf16.gmra.mxu0 %v270_v32 }
  0x40   : >> { %1240 = vmatprep.mubr.bf16.mxu0 %v271_v33 }
  0x47   : >> { %1241 = vmatmul.mubr.bf16.gmra.mxu0 %v272_v34 }
  0x48   : >> { %1244 = vmatprep.mubr.bf16.mxu0 %v273_v35 }
  0x4f   : >> { %1245 = vmatmul.mubr.bf16.gmra.mxu0 %v274_v36 }
  0xf7   : >> { %v1234_v40 = vpop.f32.mrf.mxu0 }
  0xf8   : >> { %v394_v46 = vadd.f32 %v1234_v40, %v1116_v42 }
  0xf9   : >> { %v385_v41 = vpop.f32.mrf.mxu0 }
  0xfa   : >> { %v386_v44 = vadd.f32 %v1116_v42, %v385_v41  ;;  %v450_v53 = vmax.f32 %v394_v46, 0.0 }
  0xfb   : >> { %v1235_v43 = vpop.f32.mrf.mxu0 }
  0xfc   : >> { %v397_v45 = vadd.f32 %v1235_v43, %v1116_v42  ;;  %v448_v51 = vmax.f32 %v386_v44, 0.0 }
  0xfd   : >> { %v388_v47 = vpop.f32.mrf.mxu0 }
  0xfe   : >> { %v389_v48 = vadd.f32 %v1116_v42, %v388_v47  ;;  %v451_v49 = vmax.f32 %v397_v45, 0.0 }
  0xff   : >> { %v1238_v50 = vpop.f32.mrf.mxu0 }
 0x100   : >> { %v449_v52 = vmax.f32 %v389_v48, 0.0  ;;  %v465_v56 = vpack.c.bf16 %v451_v49, %v450_v53  ;;  %v410_v60 = vadd.f32 %v1238_v50, %v1116_v42  ;;  %v1145_v50 = vld [vmem:[%s1845_s11 + $0x1] ss:$0 sm:$0xff] }
 0x101   : >> { %v401_v54 = vpop.f32.mrf.mxu0 }
 0x102   : >> { %v464_v55 = vpack.c.bf16 %v449_v52, %v448_v51  ;;  %v402_v58 = vadd.f32 %v1116_v42, %v401_v54  ;;  %v454_v19 = vmax.f32 %v410_v60, 0.0 }
 0x103   : >> { %v1239_v57 = vpop.f32.mrf.mxu0 }
 0x104   : >> { %v413_v59 = vadd.f32 %v1239_v57, %v1116_v42  ;;  %1264 = vmatprep.mubr.bf16.mxu1 %v464_v55  ;;  %v452_v17 = vmax.f32 %v402_v58, 0.0 }
 0x105   : >> { %v404_v61 = vpop.f32.mrf.mxu0  ;;  %1265 = vmatmul.mubr.bf16.vlgmr.msra.gmra.mxu1 %v465_v56 }
 0x106   : >> { %v405_v62 = vadd.f32 %v1116_v42, %v404_v61  ;;  %v455_v63 = vmax.f32 %v413_v59, 0.0 }
 0x107   : >> { %v1242_v16 = vpop.f32.mrf.mxu0 }
 0x108   : >> { %v453_v18 = vmax.f32 %v405_v62, 0.0  ;;  %v467_v22 = vpack.c.bf16 %v455_v63, %v454_v19  ;;  %v426_v26 = vadd.f32 %v1242_v16, %v1116_v42 }
 0x109   : >> { %v417_v20 = vpop.f32.mrf.mxu0 }
 0x10a   : >> { %v466_v21 = vpack.c.bf16 %v453_v18, %v452_v17  ;;  %v418_v24 = vadd.f32 %v1116_v42, %v417_v20  ;;  %v458_v33 = vmax.f32 %v426_v26, 0.0 }
 0x10b   : >> { %v1243_v23 = vpop.f32.mrf.mxu0 }
 0x10c   : >> { %v429_v25 = vadd.f32 %v1243_v23, %v1116_v42  ;;  %1268 = vmatprep.mubr.bf16.mxu1 %v466_v21  ;;  %v456_v31 = vmax.f32 %v418_v24, 0.0 }
 0x10d   : >> { %v420_v27 = vpop.f32.mrf.mxu0  ;;  %1269 = vmatmul.mubr.bf16.gmra.mxu1 %v467_v22 }
 0x10e   : >> { %v421_v28 = vadd.f32 %v1116_v42, %v420_v27  ;;  %v459_v29 = vmax.f32 %v429_v25, 0.0 }
 0x10f   : >> { %v1246_v30 = vpop.f32.mrf.mxu0 }
 0x110   : >> { %v457_v32 = vmax.f32 %v421_v28, 0.0  ;;  %v469_v36 = vpack.c.bf16 %v459_v29, %v458_v33  ;;  %v442_v40 = vadd.f32 %v1246_v30, %v1116_v42 }
 0x111   : >> { %v433_v34 = vpop.f32.mrf.mxu0 }
 0x112   : >> { %v468_v35 = vpack.c.bf16 %v457_v32, %v456_v31  ;;  %v434_v38 = vadd.f32 %v1116_v42, %v433_v34  ;;  %v462_v47 = vmax.f32 %v442_v40, 0.0 }
 0x113   : >> { %v1247_v37 = vpop.f32.mrf.mxu0 }
 0x114   : >> { %v445_v39 = vadd.f32 %v1247_v37, %v1116_v42  ;;  %1272 = vmatprep.mubr.bf16.mxu1 %v468_v35  ;;  %v460_v45 = vmax.f32 %v434_v38, 0.0 }
 0x115   : >> { %v436_v41 = vpop.f32.mrf.mxu0  ;;  %1273 = vmatmul.mubr.bf16.gmra.mxu1 %v469_v36 }
 0x116   : >> { %v437_v43 = vadd.f32 %v1116_v42, %v436_v41  ;;  %v463_v44 = vmax.f32 %v445_v39, 0.0 }
 0x118   : >> { %v461_v46 = vmax.f32 %v437_v43, 0.0  ;;  %v471_v49 = vpack.c.bf16 %v463_v44, %v462_v47 }
 0x11a   : >> { %v470_v48 = vpack.c.bf16 %v461_v46, %v460_v45 }
 0x11c   : >> { %1276 = vmatprep.mubr.bf16.mxu1 %v470_v48 }
 0x11d   : >> { %1277 = vmatmul.mubr.bf16.gmra.mxu1 %v471_v49 }
 0x1c5   : >> { %v1266_v51 = vpop.f32.mrf.mxu1 }
 0x1c6   : >> { %v591_v52 = vadd.f32 %v1266_v51, %v1145_v50 }
 0x1c7   : >> { %v582_v53 = vpop.f32.mrf.mxu1 }
 0x1c8   : >> { %v1850_v2 = vadd.f32 %v1658_v2, %v591_v52  ;;  %v583_v55 = vadd.f32 %v1145_v50, %v582_v53 }
 0x1c9   : >> { %v1267_v56 = vpop.f32.mrf.mxu1 }
 0x1ca   : >> { %v2141_v54 = vmov %v1850_v2  ;;  %v1854_v0 = vadd.f32 %v1666_v0, %v583_v55  ;;  %v594_v58 = vadd.f32 %v1267_v56, %v1145_v50 }
 0x1cb   : >> { %v663_v57 = vmax.f32 %v2141_v54, 0.0   ;;  %v585_v59 = vpop.f32.mrf.mxu1 }
 0x1cc   : >> { %v2142_v42 = vmov %v1854_v0  ;;  %v1858_v3 = vadd.f32 %v1654_v3, %v594_v58  ;;  %v586_v62 = vadd.f32 %v1145_v50, %v585_v59  ;;  %v1489_v58 = vld [vmem:[%s2138_s3 + $0x30] sm:$0xff] (%p1908_p4)  }
 0x1cd   : >> { %v661_v60 = vmax.f32 %v2142_v42, 0.0   ;;  %v1270_v63 = vpop.f32.mrf.mxu1  ;;  %v1494_v42 = vld [vmem:[%s2138_s3 + $0x8] sm:$0xff] (%p1908_p4)  }
 0x1ce   : >> { %v2143_v61 = vmov %v1858_v3  ;;  %v1862_v1 = vadd.f32 %v1662_v1, %v586_v62  ;;  %v607_v2 = vadd.f32 %v1270_v63, %v1145_v50 }
 0x1cf   : >> { %v664_v16 = vmax.f32 %v2143_v61, 0.0   ;;  %v598_v18 = vpop.f32.mrf.mxu1 }
 0x1d0   : >> { %v2144_v17 = vmov %v1862_v1  ;;  %v1866_v6 = vadd.f32 %v1642_v6, %v607_v2  ;;  %v599_v0 = vadd.f32 %v1145_v50, %v598_v18  ;;  %v2169_v2 = vmov %v663_v57  ;;  %v2031_v18 = vld [vmem:[%s2139_s4] ss:$0 sm:$0xff] (%p1908_p4) }
 0x1d1   : >> { %v662_v19 = vmax.f32 %v2144_v17, 0.0   ;;  %v1271_v21 = vpop.f32.mrf.mxu1  ;;  %v678_v63 = vpack.c.bf16 (%p1908_p4), %v664_v16, %v663_v57 }
 0x1d2   : >> { %v2145_v20 = vmov %v1866_v6  ;;  %v1870_v4 = vadd.f32 %v1650_v4, %v599_v0  ;;  %v610_v3 = vadd.f32 %v1271_v21, %v1145_v50  ;;  %v2171_v0 = vmov %v661_v60 }
 0x1d3   : >> { %v667_v22 = vmax.f32 %v2145_v20, 0.0   ;;  %v601_v24 = vpop.f32.mrf.mxu1  ;;  %v677_v59 = vpack.c.bf16 (%p1908_p4), %v662_v19, %v661_v60  ;;  %v1495_v60 = vld [vmem:[%s2138_s3] sm:$0xff] (%p1908_p4)  }
 0x1d4   : >> { %v2146_v23 = vmov %v1870_v4  ;;  %v1874_v7 = vadd.f32 %v1638_v7, %v610_v3  ;;  %v602_v1 = vadd.f32 %v1145_v50, %v601_v24  ;;  %v2168_v3 = vmov %v664_v16 }
 0x1d5   : >> { %v665_v25 = vmax.f32 %v2146_v23, 0.0   ;;  %v1274_v27 = vpop.f32.mrf.mxu1  ;;  %1296 = vmatprep.mubr.bf16.mxu0 (%p1908_p4), %v677_v59  ;;  %v853_v16 = vlaneseq (%p1908_p4) }
 0x1d6   : >> { %v2147_v26 = vmov %v1874_v7  ;;  %v1878_v5 = vadd.f32 %v1646_v5, %v602_v1  ;;  %v623_v6 = vadd.f32 %v1274_v27, %v1145_v50  ;;  %v2170_v1 = vmov %v662_v19 }
 0x1d7   : >> { %v668_v28 = vmax.f32 %v2147_v26, 0.0   ;;  %v614_v30 = vpop.f32.mrf.mxu1  ;;  %v2033_v19 = vand.u32 (%p1908_p4), 127, %v853_v16 }
 0x1d8   : >> { %v2148_v29 = vmov %v1878_v5  ;;  %v1882_v10 = vadd.f32 %v1626_v10, %v623_v6  ;;  %v615_v4 = vadd.f32 %v1145_v50, %v614_v30  ;;  %v2165_v6 = vmov %v667_v22 }
 0x1d9   : >> { %v666_v31 = vmax.f32 %v2148_v29, 0.0   ;;  %v1275_v33 = vpop.f32.mrf.mxu1  ;;  %v680_v57 = vpack.c.bf16 (%p1908_p4), %v668_v28, %v667_v22  ;;  %vm855_vm0 = vcmp.lt.s32.totalorder (%p1908_p4), %v2033_v19, 4 }
 0x1da   : >> { %v2149_v32 = vmov %v1882_v10  ;;  %v653_v7 = vadd.f32 %v1634_v8, %v615_v4  ;;  %v626_v35 = vadd.f32 %v1275_v33, %v1145_v50  ;;  %v2167_v4 = vmov %v665_v25 }
 0x1db   : >> { %v671_v34 = vmax.f32 %v2149_v32, 0.0   ;;  %v617_v36 = vpop.f32.mrf.mxu1  ;;  %v679_v2 = vpack.c.bf16 (%p1908_p4), %v666_v31, %v665_v25 }
 0x1dc   : >> { %v669_v37 = vmax.f32 %v653_v7, 0.0   ;;  %v1887_v11 = vadd.f32 %v1622_v11, %v626_v35  ;;  %v618_v5 = vadd.f32 %v1145_v50, %v617_v36  ;;  %v2164_v7 = vmov %v668_v28 }
 0x1dd   : >> { %v1278_v39 = vpop.f32.mrf.mxu1 }
 0x1de   : >> { %v2150_v38 = vmov %v1887_v11  ;;  %v654_v41 = vadd.f32 %v1630_v9, %v618_v5  ;;  %v639_v43 = vadd.f32 %v1278_v39, %v1145_v50  ;;  %v2166_v5 = vmov %v666_v31 }
 0x1df   : >> { %v672_v40 = vmax.f32 %v2150_v38, 0.0   ;;  %v630_v10 = vpop.f32.mrf.mxu1 }
 0x1e0   : >> { %v670_v44 = vmax.f32 %v654_v41, 0.0   ;;  %v1892_v14 = vadd.f32 %v1610_v14, %v639_v43  ;;  %v631_v46 = vadd.f32 %v1145_v50, %v630_v10  ;;  %v2161_v10 = vmov %v671_v34 }
 0x1e1   : >> { %v1279_v8 = vpop.f32.mrf.mxu1  ;;  %v682_v17 = vpack.c.bf16 (%p1908_p4), %v672_v40, %v671_v34 }
 0x1e2   : >> { %v2151_v45 = vmov %v1892_v14  ;;  %v1896_v12 = vadd.f32 %v1618_v12, %v631_v46  ;;  %v642_v11 = vadd.f32 %v1279_v8, %v1145_v50  ;;  %v2163_v8 = vmov %v669_v37 }
 0x1e3   : >> { %v675_v47 = vmax.f32 %v2151_v45, 0.0   ;;  %v633_v49 = vpop.f32.mrf.mxu1  ;;  %v681_v62 = vpack.c.bf16 (%p1908_p4), %v670_v44, %v669_v37 }
 0x1e4   : >> { %v2152_v48 = vmov %v1896_v12  ;;  %v1900_v15 = vadd.f32 %v1606_v15, %v642_v11  ;;  %v634_v9 = vadd.f32 %v1145_v50, %v633_v49  ;;  %v2160_v11 = vmov %v672_v40  ;;  %v1488_v50 = vld [vmem:[%s2138_s3 + $0x38] sm:$0xff] (%p1908_p4)  }
 0x1e5   : >> { %v673_v51 = vmax.f32 %v2152_v48, 0.0   ;;  %v2157_v14 = vmov %v675_v47  ;;  %1280 = vmatprep.subr.bf16.mxu0 (%p1908_p4), %v1488_v50  ;;  %1312 = vmatprep.subr.bf16.mxu1 (%p1908_p4), %v1488_v50 }
 0x1e6   : >> { %v2153_v52 = vmov %v1900_v15  ;;  %v1904_v13 = vadd.f32 %v1614_v13, %v634_v9  ;;  %v2162_v9 = vmov %v670_v44  ;;  %1281 = vmatpush3.bf16.msra.mxu0 (%p1908_p4), %v1488_v50  ;;  %1320 = vmatpush3.bf16.msra.mxu1 (%p1908_p4), %v1488_v50  ;;  %v1492_v14 = vld [vmem:[%s2138_s3 + $0x18] sm:$0xff] (%p1908_p4)  }
 0x1e7   : >> { %v676_v53 = vmax.f32 %v2153_v52, 0.0   ;;  %v2159_v12 = vmov %v673_v51  ;;  %249 = sbr.rel (!%p1908_p4) target bundleno = 20 (0x14), region = 81  ;;  %1282 = vmatprep.subr.bf16.mxu0 (%p1908_p4), %v1489_v58  ;;  %1313 = vmatprep.subr.bf16.mxu1 (%p1908_p4), %v1489_v58 }
 0x1e8   : >> { %v2154_v55 = vmov %v1904_v13  ;;  %v1490_v12 = vld [vmem:[%s2138_s3 + $0x28] sm:$0xff] (%p1908_p4)   ;;  %1304 = vmatprep.mubr.bf16.mxu1 (%p1908_p4), %v681_v62 }
 0x1e9   : >> { %v674_v56 = vmax.f32 %v2154_v55, 0.0   ;;  %v2156_v15 = vmov %v676_v53  ;;  %v684_v61 = vpack.c.bf16 (%p1908_p4), %v676_v53, %v675_v47 }
 0x1ea   : > { %1283 = vmatpush3.bf16.msra.mxu0 (%p1908_p4), %v1489_v58  ;;  %1321 = vmatpush3.bf16.msra.mxu1 (%p1908_p4), %v1489_v58  ;;  %v1493_v15 = vld [vmem:[%s2138_s3 + $0x10] sm:$0xff] (%p1908_p4)  }
 0x1eb   : >> { %v2158_v13 = vmov %v674_v56  ;;  %1284 = vmatprep.subr.bf16.mxu0 (%p1908_p4), %v1490_v12  ;;  %1314 = vmatprep.subr.bf16.mxu1 (%p1908_p4), %v1490_v12  ;;  %v683_v54 = vpack.c.bf16 (%p1908_p4), %v674_v56, %v673_v51 }
 0x1ec   : > { %v1491_v13 = vld [vmem:[%s2138_s3 + $0x20] sm:$0xff]  }
 0x1ee   : > { %1285 = vmatpush3.bf16.msra.mxu0 %v1490_v12  ;;  %1322 = vmatpush3.bf16.msra.mxu1 %v1490_v12 }
 0x1ef   : > { %1286 = vmatprep.subr.bf16.mxu0 %v1491_v13  ;;  %1315 = vmatprep.subr.bf16.mxu1 %v1491_v13 }
 0x1f2   : > { %1287 = vmatpush3.bf16.msra.mxu0 %v1491_v13  ;;  %1323 = vmatpush3.bf16.msra.mxu1 %v1491_v13 }
 0x1f3   : > { %1288 = vmatprep.subr.bf16.mxu0 %v1492_v14  ;;  %1316 = vmatprep.subr.bf16.mxu1 %v1492_v14 }
 0x1f6   : > { %1289 = vmatpush3.bf16.msra.mxu0 %v1492_v14  ;;  %1324 = vmatpush3.bf16.msra.mxu1 %v1492_v14 }
 0x1f7   : > { %1290 = vmatprep.subr.bf16.mxu0 %v1493_v15  ;;  %1317 = vmatprep.subr.bf16.mxu1 %v1493_v15 }
 0x1fa   : > { %1291 = vmatpush3.bf16.msra.mxu0 %v1493_v15  ;;  %1325 = vmatpush3.bf16.msra.mxu1 %v1493_v15 }
 0x1fb   : > { %1292 = vmatprep.subr.bf16.mxu0 %v1494_v42  ;;  %1318 = vmatprep.subr.bf16.mxu1 %v1494_v42 }
 0x1fe   : > { %1293 = vmatpush3.bf16.msra.mxu0 %v1494_v42  ;;  %1326 = vmatpush3.bf16.msra.mxu1 %v1494_v42 }
 0x1ff   : > { %1294 = vmatprep.subr.bf16.mxu0 %v1495_v60  ;;  %1319 = vmatprep.subr.bf16.mxu1 %v1495_v60 }
 0x202   : > { %1295 = vmatpush3.bf16.msra.mxu0 %v1495_v60  ;;  %1327 = vmatpush3.bf16.msra.mxu1 %v1495_v60 }
 0x205   : > { %1297 = vmatmul.mubr.bf16.vlgmr.msra.gmra.mxu0 %v678_v63  ;;  %1305 = vmatmul.mubr.bf16.vlgmr.msra.gmra.mxu1 %v682_v17 }
 0x206   : > { %1300 = vmatprep.mubr.bf16.mxu0 %v679_v2  ;;  %1308 = vmatprep.mubr.bf16.mxu1 %v683_v54 }
 0x20d   : > { %1301 = vmatmul.mubr.bf16.gmra.mxu0 %v680_v57  ;;  %1309 = vmatmul.mubr.bf16.gmra.mxu1 %v684_v61 }
 0x2c5   : > { %v1298_v0 = vpop.f32.mrf.mxu0  ;;  %v1306_v20 = vpop.f32.mrf.mxu1 }
 0x2c6   : > { %v799_v21 = vadd.f32 %v1298_v0, %v2031_v18  ;;  %v831_v22 = vadd.f32 %v1306_v20, %v2031_v18 }
 0x2c7   : > { %v790_v23 = vpop.f32.mrf.mxu0  ;;  %v822_v3 = vpop.f32.mrf.mxu1 }
 0x2c8   : > { %v858_v24 = vmul.f32 0.5, %v799_v21  ;;  %v866_v25 = vmul.f32 0.5, %v831_v22  ;;  %v791_v26 = vadd.f32 %v2031_v18, %v790_v23  ;;  %v823_v1 = vadd.f32 %v2031_v18, %v822_v3 }
 0x2c9   : > { %v1299_v27 = vpop.f32.mrf.mxu0  ;;  %v1307_v28 = vpop.f32.mrf.mxu1 }
 0x2ca   : > { %v874_v29 = vsel %vm855_vm0, %v858_v24, %v799_v21  ;;  %v882_v6 = vsel %vm855_vm0, %v866_v25, %v831_v22  ;;  %v856_v30 = vmul.f32 0.5, %v791_v26  ;;  %v864_v31 = vmul.f32 0.5, %v823_v1 }
 0x2cb   : > { %1496 = vtanh.f32 %v874_v29  ;;  %v802_v32 = vadd.f32 %v1299_v27, %v2031_v18  ;;  %v834_v4 = vadd.f32 %v1307_v28, %v2031_v18  ;;  %v793_v33 = vpop.f32.mrf.mxu0  ;;  %v825_v34 = vpop.f32.mrf.mxu1 }
 0x2cc   : > { %1498 = vtanh.f32 %v882_v6  ;;  %v872_v7 = vsel %vm855_vm0, %v856_v30, %v791_v26  ;;  %v880_v35 = vsel %vm855_vm0, %v864_v31, %v823_v1  ;;  %v794_v36 = vadd.f32 %v2031_v18, %v793_v33 }
 0x2cd   : > { %1500 = vtanh.f32 %v872_v7  ;;  %v859_v37 = vmul.f32 0.5, %v802_v32  ;;  %v867_v38 = vmul.f32 0.5, %v834_v4  ;;  %v826_v5 = vadd.f32 %v2031_v18, %v825_v34  ;;  %v1302_v39 = vpop.f32.mrf.mxu0  ;;  %v1310_v40 = vpop.f32.mrf.mxu1 }
 0x2ce   : > { %1502 = vtanh.f32 %v880_v35  ;;  %v857_v41 = vmul.f32 0.5, %v794_v36  ;;  %v815_v43 = vadd.f32 %v1302_v39, %v2031_v18  ;;  %v847_v10 = vadd.f32 %v1310_v40, %v2031_v18 }
 0x2cf   : > { %v875_v44 = vsel %vm855_vm0, %v859_v37, %v802_v32  ;;  %v883_v45 = vsel %vm855_vm0, %v867_v38, %v834_v4  ;;  %v865_v46 = vmul.f32 0.5, %v826_v5  ;;  %v806_v8 = vpop.f32.mrf.mxu0  ;;  %v838_v47 = vpop.f32.mrf.mxu1 }
 0x2d0   : > { %1504 = vtanh.f32 %v875_v44  ;;  %v873_v48 = vsel %vm855_vm0, %v857_v41, %v794_v36  ;;  %v862_v11 = vmul.f32 0.5, %v815_v43  ;;  %v870_v49 = vmul.f32 0.5, %v847_v10 }
 0x2d1   : > { %1506 = vtanh.f32 %v883_v45  ;;  %v881_v51 = vsel %vm855_vm0, %v865_v46, %v826_v5  ;;  %v807_v52 = vadd.f32 %v2031_v18, %v806_v8  ;;  %v839_v9 = vadd.f32 %v2031_v18, %v838_v47  ;;  %v1303_v53 = vpop.f32.mrf.mxu0  ;;  %v1311_v55 = vpop.f32.mrf.mxu1 }
 0x2d2   : > { %1508 = vtanh.f32 %v873_v48  ;;  %v878_v56 = vsel %vm855_vm0, %v862_v11, %v815_v43  ;;  %v886_v50 = vsel %vm855_vm0, %v870_v49, %v847_v10  ;;  %v818_v58 = vadd.f32 %v1303_v53, %v2031_v18 }
 0x2d3   : > { %1510 = vtanh.f32 %v881_v51  ;;  %v860_v59 = vmul.f32 0.5, %v807_v52  ;;  %v868_v62 = vmul.f32 0.5, %v839_v9  ;;  %v850_v12 = vadd.f32 %v1311_v55, %v2031_v18  ;;  %v809_v13 = vpop.f32.mrf.mxu0  ;;  %v841_v14 = vpop.f32.mrf.mxu1 }
 0x2d4   : > { %1512 = vtanh.f32 %v878_v56  ;;  %v863_v15 = vmul.f32 0.5, %v818_v58  ;;  %v810_v42 = vadd.f32 %v2031_v18, %v809_v13  ;;  %v842_v60 = vadd.f32 %v2031_v18, %v841_v14 }
 0x2d5   : > { %1514 = vtanh.f32 %v886_v50  ;;  %v876_v63 = vsel %vm855_vm0, %v860_v59, %v807_v52  ;;  %v884_v17 = vsel %vm855_vm0, %v868_v62, %v839_v9  ;;  %v871_v2 = vmul.f32 0.5, %v850_v12 }
 0x2d6   : > { %1516 = vtanh.f32 %v876_v63  ;;  %v879_v54 = vsel %vm855_vm0, %v863_v15, %v818_v58  ;;  %v861_v57 = vmul.f32 0.5, %v810_v42  ;;  %v869_v61 = vmul.f32 0.5, %v842_v60 }
 0x2d7   : > { %1518 = vtanh.f32 %v884_v17  ;;  %v887_v16 = vsel %vm855_vm0, %v871_v2, %v850_v12 }
 0x2d8   : > { %v1497_v0 = vpop.eup %1496  ;;  %1520 = vtanh.f32 %v879_v54  ;;  %v877_v18 = vsel %vm855_vm0, %v861_v57, %v810_v42  ;;  %v885_v20 = vsel %vm855_vm0, %v869_v61, %v842_v60 }
 0x2d9   : > { %v1499_v21 = vpop.eup %1498  ;;  %v906_v22 = vadd.f32 1.0, %v1497_v0  ;;  %1522 = vtanh.f32 %v887_v16 }
 0x2da   : > { %v1501_v23 = vpop.eup %1500  ;;  %v914_v3 = vadd.f32 1.0, %v1499_v21  ;;  %1524 = vtanh.f32 %v877_v18 }
 0x2db   : > { %v1503_v24 = vpop.eup %1502  ;;  %v922_v25 = vmul.f32 0.5, %v906_v22  ;;  %v904_v26 = vadd.f32 1.0, %v1501_v23  ;;  %1526 = vtanh.f32 %v885_v20 }
 0x2dc   : > { %v930_v1 = vmul.f32 0.5, %v914_v3  ;;  %v912_v27 = vadd.f32 1.0, %v1503_v24 }
 0x2dd   : > { %v1505_v28 = vpop.eup %1504  ;;  %v938_v29 = vmin.f32 %v922_v25, 0.99999994  ;;  %v920_v6 = vmul.f32 0.5, %v904_v26 }
 0x2de   : > { %v1507_v30 = vpop.eup %1506  ;;  %v946_v31 = vmin.f32 %v930_v1, 0.99999994  ;;  %v928_v32 = vmul.f32 0.5, %v912_v27  ;;  %v907_v4 = vadd.f32 1.0, %v1505_v28 }
 0x2df   : > { %v1509_v33 = vpop.eup %1508  ;;  %v954_v34 = vsel %vm855_vm0, %v938_v29, %v1497_v0  ;;  %v936_v7 = vmin.f32 %v920_v6, 0.99999994  ;;  %v915_v35 = vadd.f32 1.0, %v1507_v30 }
 0x2e0   : > { %v1511_v36 = vpop.eup %1510  ;;  %970 = vst [vmem:[%s1716_s27 + $0x10] sm:$0xff] %v954_v34  ;;  %v962_v37 = vsel %vm855_vm0, %v946_v31, %v1499_v21  ;;  %v944_v38 = vmin.f32 %v928_v32, 0.99999994  ;;  %v923_v5 = vmul.f32 0.5, %v907_v4  ;;  %v905_v39 = vadd.f32 1.0, %v1509_v33 }
 0x2e1   : > { %v1513_v40 = vpop.eup %1512  ;;  %978 = vst [vmem:[%s1716_s27 + $0x50] sm:$0xff] %v962_v37  ;;  %v952_v41 = vsel %vm855_vm0, %v936_v7, %v1501_v23  ;;  %v931_v43 = vmul.f32 0.5, %v915_v35  ;;  %v913_v10 = vadd.f32 1.0, %v1511_v36 }
 0x2e2   : > { %v1515_v44 = vpop.eup %1514  ;;  %968 = vst [vmem:[%s1716_s27] sm:$0xff] %v952_v41  ;;  %v960_v45 = vsel %vm855_vm0, %v944_v38, %v1503_v24  ;;  %v939_v46 = vmin.f32 %v923_v5, 0.99999994  ;;  %v921_v8 = vmul.f32 0.5, %v905_v39  ;;  %v910_v47 = vadd.f32 1.0, %v1513_v40 }
 0x2e3   : > { %v1517_v48 = vpop.eup %1516  ;;  %976 = vst [vmem:[%s1716_s27 + $0x40] sm:$0xff] %v960_v45  ;;  %v947_v11 = vmin.f32 %v931_v43, 0.99999994  ;;  %v929_v49 = vmul.f32 0.5, %v913_v10  ;;  %v918_v51 = vadd.f32 1.0, %v1515_v44 }
 0x2e4   : > { %v1519_v52 = vpop.eup %1518  ;;  %v955_v9 = vsel %vm855_vm0, %v939_v46, %v1505_v28  ;;  %v937_v53 = vmin.f32 %v921_v8, 0.99999994  ;;  %v926_v55 = vmul.f32 0.5, %v910_v47  ;;  %v908_v56 = vadd.f32 1.0, %v1517_v48 }
 0x2e5   : > { %v1521_v50 = vpop.eup %1520  ;;  %971 = vst [vmem:[%s1716_s27 + $0x18] sm:$0xff] %v955_v9  ;;  %v963_v58 = vsel %vm855_vm0, %v947_v11, %v1507_v30  ;;  %v945_v59 = vmin.f32 %v929_v49, 0.99999994  ;;  %v934_v62 = vmul.f32 0.5, %v918_v51  ;;  %v916_v12 = vadd.f32 1.0, %v1519_v52 }
 0x2e6   : > { %v1523_v13 = vpop.eup %1522  ;;  %979 = vst [vmem:[%s1716_s27 + $0x58] sm:$0xff] %v963_v58  ;;  %v953_v14 = vsel %vm855_vm0, %v937_v53, %v1509_v33  ;;  %v942_v15 = vmin.f32 %v926_v55, 0.99999994  ;;  %v924_v42 = vmul.f32 0.5, %v908_v56  ;;  %v911_v60 = vadd.f32 1.0, %v1521_v50 }
 0x2e7   : > { %v1525_v63 = vpop.eup %1524  ;;  %969 = vst [vmem:[%s1716_s27 + $0x8] sm:$0xff] %v953_v14  ;;  %v961_v17 = vsel %vm855_vm0, %v945_v59, %v1511_v36  ;;  %v950_v2 = vmin.f32 %v934_v62, 0.99999994  ;;  %v932_v54 = vmul.f32 0.5, %v916_v12  ;;  %v919_v57 = vadd.f32 1.0, %v1523_v13 }
 0x2e8   : > { %v1527_v61 = vpop.eup %1526  ;;  %977 = vst [vmem:[%s1716_s27 + $0x48] sm:$0xff] %v961_v17  ;;  %v958_v16 = vsel %vm855_vm0, %v942_v15, %v1513_v40  ;;  %v940_v0 = vmin.f32 %v924_v42, 0.99999994  ;;  %v927_v18 = vmul.f32 0.5, %v911_v60  ;;  %v909_v20 = vadd.f32 1.0, %v1525_v63 }
 0x2e9   : > { %974 = vst [vmem:[%s1716_s27 + $0x30] sm:$0xff] %v958_v16  ;;  %v966_v21 = vsel %vm855_vm0, %v950_v2, %v1515_v44  ;;  %v948_v22 = vmin.f32 %v932_v54, 0.99999994  ;;  %v935_v23 = vmul.f32 0.5, %v919_v57  ;;  %v917_v3 = vadd.f32 1.0, %v1527_v61 }
 0x2ea   : > { %982 = vst [vmem:[%s1716_s27 + $0x70] sm:$0xff] %v966_v21  ;;  %v956_v24 = vsel %vm855_vm0, %v940_v0, %v1517_v48  ;;  %v943_v25 = vmin.f32 %v927_v18, 0.99999994  ;;  %v925_v26 = vmul.f32 0.5, %v909_v20 }
 0x2eb   : > { %972 = vst [vmem:[%s1716_s27 + $0x20] sm:$0xff] %v956_v24  ;;  %v964_v1 = vsel %vm855_vm0, %v948_v22, %v1519_v52  ;;  %v951_v27 = vmin.f32 %v935_v23, 0.99999994  ;;  %v933_v28 = vmul.f32 0.5, %v917_v3 }
 0x2ec   : > { %980 = vst [vmem:[%s1716_s27 + $0x60] sm:$0xff] %v964_v1  ;;  %v959_v29 = vsel %vm855_vm0, %v943_v25, %v1521_v50  ;;  %v941_v6 = vmin.f32 %v925_v26, 0.99999994 }
 0x2ed   : > { %975 = vst [vmem:[%s1716_s27 + $0x38] sm:$0xff] %v959_v29  ;;  %v967_v30 = vsel %vm855_vm0, %v951_v27, %v1523_v13  ;;  %v949_v31 = vmin.f32 %v933_v28, 0.99999994 }
 0x2ee   : > { %983 = vst [vmem:[%s1716_s27 + $0x78] sm:$0xff] %v967_v30  ;;  %v957_v32 = vsel %vm855_vm0, %v941_v6, %v1525_v63 }
 0x2ef   : > { %973 = vst [vmem:[%s1716_s27 + $0x28] sm:$0xff] %v957_v32  ;;  %v965_v4 = vsel %vm855_vm0, %v949_v31, %v1527_v61 }
 0x2f0   : > { %981 = vst [vmem:[%s1716_s27 + $0x68] sm:$0xff] %v965_v4 }
 0x2f1 PF: > { %s15_s18 = sadd.s32 1, %s1602_s18  }
 0x2f2   : > { %p12_p5 = scmp.ge.s32.totalorder %s15_s18, 4  }
 0x2f4   :  { %14 = sbr.rel (!%p12_p5) target bundleno = 1 (0x1), region = 92 }

</bundles_post_ra>
